<compile_context>
chip_gen: v7x
topology: tpu7x:2x2x1
jax: 0.10.0
libtpu: 0.0.40
codegen_flags: <defaults>
</compile_context>

<pallas_src>
import math

import jax
import jax.numpy as jnp
from jax.experimental import pallas as pl
from jax.experimental.pallas import tpu as pltpu


def _round_up(x, m):
    return (x + m - 1) // m * m


def _cdiv(a, b):
    return (a + b - 1) // b


def _vmem_budget_bytes():
    """Usable VMEM budget: physical capacity (generation-aware) minus headroom."""
    try:
        cap = int(pltpu.get_tpu_info().vmem_capacity_bytes)
    except Exception:
        cap = 64 << 20  # conservative fallback (v7x per-TC capacity)
    return max(cap - (16 << 20), 32 << 20)


# --------------------------------------------------------------------------------------
# Kernels
# --------------------------------------------------------------------------------------
def _mlp_kernel_resident(x_ref, w1_ref, b1_ref, w2_ref, b2_ref, o_ref):
    """Whole (padded) hidden dim resident in VMEM: single pass, no accumulator."""
    h = jnp.dot(x_ref[...], w1_ref[...], preferred_element_type=jnp.float32)
    h = jnp.maximum(h + b1_ref[...].astype(jnp.float32), 0.0)  # Dropout is eval-mode identity
    o_ref[...] = (
        jnp.dot(h.astype(w2_ref.dtype), w2_ref[...], preferred_element_type=jnp.float32)
        + b2_ref[...].astype(jnp.float32)
    ).astype(o_ref.dtype)


def _mlp_kernel_hidden_tiled(x_ref, w1_ref, b1_ref, w2_ref, b2_ref, o_ref, acc_ref):
    """Hidden axis tiled over grid axis 1; f32 accumulator with pl.when init/finalize."""
    k = pl.program_id(1)

    h = jnp.dot(x_ref[...], w1_ref[...], preferred_element_type=jnp.float32)
    h = jnp.maximum(h + b1_ref[...].astype(jnp.float32), 0.0)
    p = jnp.dot(h.astype(w2_ref.dtype), w2_ref[...], preferred_element_type=jnp.float32)

    @pl.when(k == 0)
    def _():
        acc_ref[...] = p  # init with first partial sum (no zero-fill / read-modify-write)

    @pl.when(k > 0)
    def _():
        acc_ref[...] += p

    @pl.when(k == pl.num_programs(1) - 1)
    def _():
        o_ref[...] = (acc_ref[...] + b2_ref[...].astype(jnp.float32)).astype(o_ref.dtype)


# --------------------------------------------------------------------------------------
# Parameter preparation (do ONCE, outside the per-call path)
# --------------------------------------------------------------------------------------
def prepare_params(w1, b1, w2, b2, *, compute_dtype=jnp.bfloat16,
                   block_hidden=None, block_batch=512):
    """Cast + zero-pad the weights once (lane-dense hidden / class axes) and pick the
    hidden tile size from the device's VMEM capacity.

    w1: [input_dim, hidden]      (transposed vs. PyTorch's [out, in])
    b1: [hidden] or [1, hidden]
    w2: [hidden, num_classes]
    b2: [num_classes] or [1, num_classes]
    compute_dtype: dtype for x/W1/W2 on the MXU (default bf16; None keeps input dtype).
                   Biases stay f32; accumulation is always f32.
    """
    d_in, hidden = w1.shape
    num_classes = w2.shape[1]

    b1 = jnp.reshape(b1, (1, hidden)).astype(jnp.float32)
    b2 = jnp.reshape(b2, (1, num_classes)).astype(jnp.float32)
    if compute_dtype is not None:
        w1 = w1.astype(compute_dtype)
        w2 = w2.astype(compute_dtype)

    wsz = jnp.dtype(w1.dtype).itemsize
    xsz = jnp.dtype(compute_dtype).itemsize if compute_dtype is not None else 4
    c_p = _round_up(num_classes, 128)
    hidden_full = _round_up(hidden, 256)          # 256-aligned: fills 2x256x256 MXU columns

    budget = _vmem_budget_bytes()
    # Activation / output / accumulator footprint at the nominal batch tile.
    tb_nom = max(int(block_batch), 8)
    act = 2 * tb_nom * d_in * xsz + 2 * tb_nom * c_p * 4 + tb_nom * c_p * 4

    if block_hidden is not None:
        th = min(_round_up(int(block_hidden), 256), hidden_full)
    else:
        # Can the whole hidden dim stay resident with single-buffered weights?
        resident = (d_in * hidden_full + hidden_full * c_p) * wsz + hidden_full * 4 + c_p * 4
        if resident + act <= budget:
            th = hidden_full
        else:
            # Hidden-tiled path: weight tiles are double-buffered to hide the HBM stream.
            per_th = 2 * (d_in + c_p) * wsz + 2 * 4
            th = (budget - act - 2 * c_p * 4) // max(per_th, 1)
            th = max(256, (th // 256) * 256)
            th = min(th, hidden_full)

    hidden_p = _round_up(hidden, th)              # always a multiple of th

    def pad2(a, rows, cols):
        r, c = a.shape
        if r == rows and c == cols:
            return a
        return jnp.pad(a, ((0, rows - r), (0, cols - c)))

    return dict(
        w1=pad2(w1, d_in, hidden_p),
        b1=pad2(b1, 1, hidden_p),
        w2=pad2(w2, hidden_p, c_p),
        b2=pad2(b2, 1, c_p),
        d_in=d_in, hidden=hidden, num_classes=num_classes,
        hidden_p=hidden_p, c_p=c_p, th=th,
        compute_dtype=compute_dtype, block_batch=int(block_batch),
    )


# --------------------------------------------------------------------------------------
# Forward
# --------------------------------------------------------------------------------------
def custom_layer_forward(x, params):
    """x: [..., input_dim] -> [..., num_classes] (leading dims flattened internally)."""
    out_dtype = x.dtype
    lead_shape = x.shape[:-1]
    d_in = params["d_in"]
    x = x.reshape(-1, x.shape[-1])
    assert x.shape[1] == d_in, "input_dim mismatch"
    B = x.shape[0]

    w1, b1, w2, b2 = params["w1"], params["b1"], params["w2"], params["b2"]
    th, hidden_p, c_p = params["th"], params["hidden_p"], params["c_p"]
    num_classes = params["num_classes"]
    compute_dtype = params["compute_dtype"]
    if compute_dtype is not None:
        x = x.astype(compute_dtype)

    nh = hidden_p // th
    sublane = 16 if x.dtype == jnp.bfloat16 else 8
    xsz = jnp.dtype(x.dtype).itemsize
    wsz = jnp.dtype(w1.dtype).itemsize
    osz = jnp.dtype(out_dtype).itemsize
    budget = _vmem_budget_bytes()

    # ---- batch tile --------------------------------------------------------------
    tb = max(sublane, _round_up(min(params["block_batch"], B), sublane))

    if nh == 1:
        # Weights are resident (constant index_map -> fetched once), so splitting the
        # batch is traffic-free: ensure >=2 tiles (feeds both TCs on v7x) and bound
        # over-padding of ragged batch sizes.
        if _cdiv(B, tb) < 2 and B > sublane:
            tb = _round_up(_cdiv(B, 2), sublane)
        while tb > sublane and (_round_up(B, tb) - B) * 4 > _round_up(B, tb):
            tb = _round_up(max(tb // 2, sublane), sublane)

    def vmem_est(tb_):
        wbufs = 1 if nh == 1 else 2               # Buffered(1) resident vs. double-buffered
        est = (2 * tb_ * d_in * xsz               # x tiles (double-buffered)
               + wbufs * d_in * th * wsz          # W1
               + wbufs * th * 4                   # b1 (f32)
               + wbufs * th * c_p * wsz           # W2
               + 1 * c_p * 4                      # b2 (Buffered(1))
               + 2 * tb_ * c_p * osz)             # out tiles
        if nh > 1:
            est += tb_ * c_p * 4                  # f32 accumulator scratch
        return est

    while tb > sublane and vmem_est(tb) > budget:
        tb = _round_up(max(tb // 2, sublane), sublane)

    b_p = _round_up(B, tb)
    nb = b_p // tb
    x_p = jnp.pad(x, ((0, b_p - B), (0, 0))) if b_p != B else x

    vmem_limit = int(min(budget + (12 << 20),
                         max(vmem_est(tb) + (4 << 20), 32 << 20)))

    # ---- specs / grid --------------------------------------------------------------
    if nh == 1:
        grid = (nb,)
        in_specs = [
            pl.BlockSpec((tb, d_in), lambda i: (i, 0)),                     # x, full K (no pad)
            pl.BlockSpec((d_in, th), lambda i: (0, 0), pipeline_mode=pl.Buffered(1)),
            pl.BlockSpec((1, th), lambda i: (0, 0), pipeline_mode=pl.Buffered(1)),
            pl.BlockSpec((th, c_p), lambda i: (0, 0), pipeline_mode=pl.Buffered(1)),
            pl.BlockSpec((1, c_p), lambda i: (0, 0), pipeline_mode=pl.Buffered(1)),
        ]
        out_specs = pl.BlockSpec((tb, c_p), lambda i: (i, 0))
        scratch = []
        kernel = _mlp_kernel_resident
        semantics = ("parallel",)
    else:
        grid = (nb, nh)
        in_specs = [
            pl.BlockSpec((tb, d_in), lambda i, k: (i, 0)),                  # x, full K (no pad)
            pl.BlockSpec((d_in, th), lambda i, k: (0, k)),                  # W1 column tile
            pl.BlockSpec((1, th), lambda i, k: (0, k)),                     # b1 tile
            pl.BlockSpec((th, c_p), lambda i, k: (k, 0)),                   # W2 row tile
            pl.BlockSpec((1, c_p), lambda i, k: (0, 0), pipeline_mode=pl.Buffered(1)),
        ]
        out_specs = pl.BlockSpec((tb, c_p), lambda i, k: (i, 0))
        scratch = [pltpu.VMEM((tb, c_p), jnp.float32)]
        kernel = _mlp_kernel_hidden_tiled
        semantics = ("parallel", "arbitrary")

    out_p = pl.pallas_call(
        kernel,
        out_shape=jax.ShapeDtypeStruct((b_p, c_p), out_dtype),
        grid_spec=pltpu.PrefetchScalarGridSpec(
            num_scalar_prefetch=0,
            grid=grid,
            in_specs=in_specs,
            out_specs=out_specs,
            scratch_shapes=scratch,
        ),
        compiler_params=pltpu.CompilerParams(
            dimension_semantics=semantics,
            vmem_limit_bytes=vmem_limit,
        ),
    )(x_p, w1, b1, w2, b2)

    out = out_p[:B, :num_classes]
    return out.reshape(*lead_shape, num_classes)


# --------------------------------------------------------------------------------------
# Init mimicking PyTorch nn.Linear defaults
# --------------------------------------------------------------------------------------
def init_params(key, input_dim, hidden_dim, num_classes, dtype=jnp.float32):
    k1, k2, k3, k4 = jax.random.split(key, 4)
    bound1 = 1.0 / math.sqrt(input_dim)
    w1 = jax.random.uniform(k1, (input_dim, hidden_dim), dtype, -bound1, bound1)
    b1 = jax.random.uniform(k2, (1, hidden_dim), dtype, -bound1, bound1)
    bound2 = 1.0 / math.sqrt(hidden_dim)
    w2 = jax.random.uniform(k3, (hidden_dim, num_classes), dtype, -bound2, bound2)
    b2 = jax.random.uniform(k4, (1, num_classes), dtype, -bound2, bound2)
    return w1, b1, w2, b2


if __name__ == "__main__":
    key = jax.random.PRNGKey(0)

    # ---- Test 1: default bf16 compute path, resident-hidden kernel, ragged K ----------
    batch, input_dim, hidden_dim, num_classes = 16, 40, 200, 10
    kx, kp = jax.random.split(key)
    x = jax.random.normal(kx, (batch, input_dim), jnp.float32)
    w1, b1, w2, b2 = init_params(kp, input_dim, hidden_dim, num_classes)
    ref = jnp.maximum(x @ w1 + b1, 0.0) @ w2 + b2          # dropout is eval-mode identity

    params_bf16 = prepare_params(w1, b1, w2, b2)            # bf16 default
    out = jax.block_until_ready(custom_layer_forward(x, params_bf16))
    assert out.shape == (batch, num_classes)
    assert jnp.allclose(out, ref, atol=5e-2, rtol=5e-2)

    # ---- Test 2: f32 path with the hidden axis tiled (accumulator / pl.when path) -----
    batch2, input_dim2, hidden_dim2, num_classes2 = 16, 72, 512, 10
    kx2, kp2 = jax.random.split(kp)
    x2 = jax.random.normal(kx2, (batch2, input_dim2), jnp.float32)
    w1b, b1b, w2b, b2b = init_params(kp2, input_dim2, hidden_dim2, num_classes2)
    ref2 = jnp.maximum(x2 @ w1b + b1b, 0.0) @ w2b + b2b

    params_f32 = prepare_params(w1b, b1b, w2b, b2b, compute_dtype=None,
                                block_hidden=256, block_batch=8)
    out2 = jax.block_until_ready(custom_layer_forward(x2, params_f32))
    assert out2.shape == (batch2, num_classes2)
    assert jnp.allclose(out2, ref2, atol=2e-2, rtol=2e-2)

    print("KERNEL_OK")
</pallas_src>

<mosaic_0001>
module attributes {stable_mosaic.version = 11 : i64} {
  func.func @_mlp_kernel_resident(%arg0: i32, %arg1: memref<16x40xbf16, #tpu.memory_space<vmem>>, %arg2: memref<40x256xbf16, #tpu.memory_space<vmem>>, %arg3: memref<1x256xf32, #tpu.memory_space<vmem>>, %arg4: memref<256x128xbf16, #tpu.memory_space<vmem>>, %arg5: memref<1x128xf32, #tpu.memory_space<vmem>>, %arg6: memref<16x128xf32, #tpu.memory_space<vmem>>) attributes {dimension_semantics = [#tpu.dimension_semantics<parallel>], iteration_bounds = array<i64: 1>, scalar_prefetch = 0 : i64, scratch_operands = 0 : i64, tpu.core_type = #tpu.core_type<tc>, window_params = [{transform_indices = @transform_0, window_bounds = array<i64: 16, 40>}, {pipeline_mode = #tpu.pipeline_mode<synchronous>, transform_indices = @transform_1, window_bounds = array<i64: 40, 256>}, {pipeline_mode = #tpu.pipeline_mode<synchronous>, transform_indices = @transform_2, window_bounds = array<i64: 1, 256>}, {pipeline_mode = #tpu.pipeline_mode<synchronous>, transform_indices = @transform_3, window_bounds = array<i64: 256, 128>}, {pipeline_mode = #tpu.pipeline_mode<synchronous>, transform_indices = @transform_4, window_bounds = array<i64: 1, 128>}, {transform_indices = @transform_5, window_bounds = array<i64: 16, 128>}]} {
    %c0 = arith.constant 0 : index
    %c0_0 = arith.constant 0 : index
    %0 = vector.load %arg1[%c0, %c0_0] : memref<16x40xbf16, #tpu.memory_space<vmem>>, vector<16x40xbf16>
    %c0_1 = arith.constant 0 : index
    %c0_2 = arith.constant 0 : index
    %1 = vector.load %arg2[%c0_1, %c0_2] : memref<40x256xbf16, #tpu.memory_space<vmem>>, vector<40x256xbf16>
    %cst = arith.constant dense<0.000000e+00> : vector<16x256xf32>
    %2 = tpu.matmul %0, %1, %cst {dimension_numbers = #tpu.dot_dimension_numbers<[1], [0], [0], [1], [0, 0, 1, 1], [], []>} : vector<16x40xbf16>, vector<40x256xbf16>, vector<16x256xf32> -> vector<16x256xf32>
    %c0_3 = arith.constant 0 : index
    %c0_4 = arith.constant 0 : index
    %3 = vector.load %arg3[%c0_3, %c0_4] : memref<1x256xf32, #tpu.memory_space<vmem>>, vector<1x256xf32>
    %4 = vector.broadcast %3 : vector<1x256xf32> to vector<16x256xf32>
    %5 = arith.addf %2, %4 : vector<16x256xf32>
    %cst_5 = arith.constant 0.000000e+00 : f32
    %6 = vector.broadcast %cst_5 : f32 to vector<16x256xf32>
    %7 = arith.maximumf %5, %6 : vector<16x256xf32>
    %8 = arith.truncf %7 : vector<16x256xf32> to vector<16x256xbf16>
    %c0_6 = arith.constant 0 : index
    %c0_7 = arith.constant 0 : index
    %9 = vector.load %arg4[%c0_6, %c0_7] : memref<256x128xbf16, #tpu.memory_space<vmem>>, vector<256x128xbf16>
    %cst_8 = arith.constant dense<0.000000e+00> : vector<16x128xf32>
    %10 = tpu.matmul %8, %9, %cst_8 {dimension_numbers = #tpu.dot_dimension_numbers<[1], [0], [0], [1], [0, 0, 1, 1], [], []>} : vector<16x256xbf16>, vector<256x128xbf16>, vector<16x128xf32> -> vector<16x128xf32>
    %c0_9 = arith.constant 0 : index
    %c0_10 = arith.constant 0 : index
    %11 = vector.load %arg5[%c0_9, %c0_10] : memref<1x128xf32, #tpu.memory_space<vmem>>, vector<1x128xf32>
    %12 = vector.broadcast %11 : vector<1x128xf32> to vector<16x128xf32>
    %13 = arith.addf %10, %12 : vector<16x128xf32>
    %c0_11 = arith.constant 0 : index
    %c0_12 = arith.constant 0 : index
    %14 = vector.load %arg6[%c0_11, %c0_12] : memref<16x128xf32, #tpu.memory_space<vmem>>, vector<16x128xf32>
    tpu.vector_store %arg6[%c0_11, %c0_12], %13 {strides = array<i32>} : memref<16x128xf32, #tpu.memory_space<vmem>>, vector<16x128xf32>,
    return
  }
  func.func @transform_0(%arg0: i32) -> (i32, i32) {
    %c0_i32 = arith.constant 0 : i32
    %c0_i32_0 = arith.constant 0 : i32
    return %arg0, %c0_i32 : i32, i32
  }
  func.func @transform_1(%arg0: i32) -> (i32, i32) {
    %c0_i32 = arith.constant 0 : i32
    %c0_i32_0 = arith.constant 0 : i32
    %c0_i32_1 = arith.constant 0 : i32
    return %c0_i32, %c0_i32_0 : i32, i32
  }
  func.func @transform_2(%arg0: i32) -> (i32, i32) {
    %c0_i32 = arith.constant 0 : i32
    %c0_i32_0 = arith.constant 0 : i32
    %c0_i32_1 = arith.constant 0 : i32
    return %c0_i32, %c0_i32_0 : i32, i32
  }
  func.func @transform_3(%arg0: i32) -> (i32, i32) {
    %c0_i32 = arith.constant 0 : i32
    %c0_i32_0 = arith.constant 0 : i32
    %c0_i32_1 = arith.constant 0 : i32
    return %c0_i32, %c0_i32_0 : i32, i32
  }
  func.func @transform_4(%arg0: i32) -> (i32, i32) {
    %c0_i32 = arith.constant 0 : i32
    %c0_i32_0 = arith.constant 0 : i32
    %c0_i32_1 = arith.constant 0 : i32
    return %c0_i32, %c0_i32_0 : i32, i32
  }
  func.func @transform_5(%arg0: i32) -> (i32, i32) {
    %c0_i32 = arith.constant 0 : i32
    %c0_i32_0 = arith.constant 0 : i32
    return %arg0, %c0_i32 : i32, i32
  }
}

</mosaic_0001>

<bundles_post_ra>
// kernel: tpu_custom_call.1
= control target key start
LH: loop header
LB: loop body
LE: loop exit
PB: predicated region body
PF: predicated region fallthrough
CT: control target
= control target key end

     0   :  { %10 = vsyncpa [#allocation3], 0  ;;  %s643_s0 = inlined_call_operand.hbm [shape: bf16[16,40], index: 0, kind: input, shape index: {}]   ;;  %s644_s1 = inlined_call_operand.hbm [shape: bf16[40,256], index: 1, kind: input, shape index: {}]   ;;  %s645_s2 = inlined_call_operand.vmem [shape: f32[1,256], index: 2, kind: input, shape index: {}]   ;;  %s646_s3 = inlined_call_operand.hbm [shape: bf16[256,128], index: 3, kind: input, shape index: {}]   ;;  %s647_s4 = inlined_call_operand.vmem [shape: f32[1,128], index: 4, kind: input, shape index: {}]   ;;  %s648_s5 = inlined_call_operand.hbm [shape: f32[16,128], index: 5, kind: output, shape index: {}]  }
   0x1   :  { %11 = vsyncpa [#allocation6], 0 }
   0x2   :  { %12 = vsyncpa [#allocation4], 0  ;;  %s544_s18 = smov [#allocation5]   ;;  %s450_s22 = scalar_lea.hbm %s644_s1, 640 }
   0x3   :  { %s30_s19 = sshll.u32 %s544_s18, 4  ;;  %p451_p0 = scmp.ne.s32.totalorder %s644_s1, %s450_s22  ;;  %s31_s19 = int_to_ptr.vmem [resolvable:$true] %s30_s19 }
   0x4   :  { %p454_p1 = scmp.lt.u32.totalorder %s450_s22, %s644_s1 }
   0x6   :  { %p456_p2 = pnand %p454_p1, %p451_p0 }
   0x8   :  { %459 = shalt.err (!%p456_p2)
}
   0x9   :  { %s460_s27 = scalar_lea.vmem %s31_s19, 640  ;;  %p465_p4 = scmp.lt.s32.totalorder %s31_s19, %s31_s19 }
   0xa   :  { %p461_p3 = scmp.ne.s32.totalorder %s31_s19, %s460_s27  ;;  %p466_p5 = scmp.lt.s32.totalorder %s460_s27, %s460_s27 }
   0xc   :  { %p467_p6 = por %p466_p5, %p465_p4 }
   0xe   :  { %p468_p7 = pnand %p467_p6, %p461_p3 }
  0x10   :  { %471 = shalt.err (!%p468_p7)
}
  0x11   :  { %s545_s28 = smov 128   ;;  %s546_s29 = smov 8  }
  0x12   :  { %36 = dma.hbm_to_vmem [thread:$0]  %s644_s1, 640, %s31_s19, [#allocation6], %s545_s28, %s545_s28, %s546_s29  }
  0x13   :  { %s547_s7 = smov [#allocation2]   ;;  %s472_s11 = scalar_lea.hbm %s643_s0, 128 }
  0x14   :  { %s18_s8 = sshll.u32 %s547_s7, 4  ;;  %p473_p8 = scmp.ne.s32.totalorder %s643_s0, %s472_s11  ;;  %s19_s8 = int_to_ptr.vmem [resolvable:$true] %s18_s8 }
  0x15   :  { %p476_p9 = scmp.lt.u32.totalorder %s472_s11, %s643_s0 }
  0x17   :  { %p478_p10 = pnand %p476_p9, %p473_p8 }
  0x19   :  { %481 = shalt.err (!%p478_p10)
}
  0x1a   :  { %s482_s16 = scalar_lea.vmem %s19_s8, 128  ;;  %p487_p12 = scmp.lt.s32.totalorder %s19_s8, %s19_s8 }
  0x1b   :  { %p483_p11 = scmp.ne.s32.totalorder %s19_s8, %s482_s16  ;;  %p488_p13 = scmp.lt.s32.totalorder %s482_s16, %s482_s16 }
  0x1d   :  { %p489_p0 = por %p488_p13, %p487_p12 }
  0x1f   :  { %p490_p1 = pnand %p489_p0, %p483_p11 }
  0x21   :  { %493 = shalt.err (!%p490_p1)
}
  0x22   :  { %s548_s1 = smov 64   ;;  %s549_s17 = smov 4  }
  0x23   :  { %24 = dma.hbm_to_vmem [thread:$0]  %s643_s0, 128, %s19_s8, [#allocation3], %s548_s1, %s548_s1, %s549_s17  }
  0x24   :  { %s550_s20 = smov [#allocation7]   ;;  %s494_s24 = scalar_lea.hbm %s646_s3, 2048 }
  0x25   :  { %s44_s21 = sshll.u32 %s550_s20, 4  ;;  %p495_p2 = scmp.ne.s32.totalorder %s646_s3, %s494_s24  ;;  %s45_s21 = int_to_ptr.vmem [resolvable:$true] %s44_s21 }
  0x26   :  { %p498_p3 = scmp.lt.u32.totalorder %s494_s24, %s646_s3 }
  0x28   :  { %p500_p4 = pnand %p498_p3, %p495_p2 }
  0x2a   :  { %503 = shalt.err (!%p500_p4)
}
  0x2b   :  { %s504_s6 = scalar_lea.vmem %s45_s21, 2048  ;;  %p509_p6 = scmp.lt.s32.totalorder %s45_s21, %s45_s21 }
  0x2c   :  { %p505_p5 = scmp.ne.s32.totalorder %s45_s21, %s504_s6  ;;  %p510_p7 = scmp.lt.s32.totalorder %s504_s6, %s504_s6 }
  0x2e   :  { %p511_p8 = por %p510_p7, %p509_p6 }
  0x30   :  { %p512_p9 = pnand %p511_p8, %p505_p5 }
  0x32   :  { %515 = shalt.err (!%p512_p9)
}
  0x33   :  { %50 = dma.hbm_to_vmem [thread:$0]  %s646_s3, 2048, %s45_s21, [#allocation6], %s548_s1, %s548_s1, %s549_s17  }
  0x34   :  { %538 = dma.done.wait [#allocation3], 128  }
  0x35   :  { %539 = vsyncadd [#allocation3], 4294967168 }
  0x36   :  { %540 = dma.done.wait [#allocation6], 2688  }
  0x37   :  { %541 = vsyncadd [#allocation6], 4294964608  ;;  %v551_v0 = vmov 0   ;;  %v425_v1 = vld [vmem:[#allocation5 + $0x4] ss:$8 sps:$4 sm:$0xff]   ;;  %vm116_vm0 = vcmask 1043456   ;;  %v72_v26 = vlaneseq }
  0x38   :  { %155 = vmatprep.mubr.bf16.mxu0 %v551_v0  ;;  %v427_v2 = vld [vmem:[#allocation5] ss:$8 sps:$4 sm:$0xff]   ;;  %123 = vmatprep.subr.bf16.mxu0 %v425_v1  ;;  %v428_v3 = vld [vmem:[#allocation5 + $0x14] ss:$8 sps:$4 sm:$0xff]   ;;  %v430_v5 = vld [vmem:[#allocation5 + $0x10] ss:$8 sps:$4 sm:$0xff]  }
  0x39   :  { %v69_v4 = vld [vmem:[#allocation5 + $0x20] sm:$0xff]  ;;  %124 = vmatpush1.bf16.msra.mxu0 %v427_v2  ;;  %v434_v8 = vld [vmem:[#allocation7 + $0x40] sm:$0xff]   ;;  %v436_v10 = vld [vmem:[#allocation7 + $0x48] sm:$0xff]   ;;  %vm112_vm1 = vcmask 326656   ;;  %v73_v27 = vshrl.u32 %v72_v26, 7  ;;  %s552_s10 = smov [#allocation8]  }
  0x3a   :  { %125 = vmatprep.subr.bf16.mxu0 %v428_v3  ;;  %v374_v6 = vcombine.high %v69_v4, %v69_v4  ;;  %v373_v7 = vcombine.low %v69_v4, %v69_v4  ;;  %v435_v9 = vld [vmem:[#allocation7] sm:$0xff]   ;;  %394 = vmatprep.subr.bf16.mxu1 %v434_v8  ;;  %v437_v11 = vld [vmem:[#allocation7 + $0x8] sm:$0xff]   ;;  %v438_v13 = vld [vmem:[#allocation7 + $0x50] sm:$0xff]   ;;  %s355_s11 = sshll.u32 %s552_s10, 4  ;;  %s356_s11 = int_to_ptr.vmem [resolvable:$true] %s355_s11 }
  0x3b   :  { %395 = vmatpush3.bf16.msra.mxu1 %v435_v9  ;;  %v433_v14 = vld [vmem:[#allocation2] sm:$0xff]   ;;  %v440_v16 = vld [vmem:[#allocation7 + $0x58] sm:$0xff]   ;;  %v442_v18 = vld [vmem:[#allocation7 + $0x60] sm:$0xff]   ;;  %v74_v28 = vsub.s32 0, %v73_v27  ;;  %v78_v30 = vsub.s32 1, %v73_v27  ;;  %s516_s12 = scalar_lea.vmem %s356_s11, 256  ;;  %p521_p11 = scmp.lt.s32.totalorder %s356_s11, %s356_s11 }
  0x3c   :  { %v118_v12 = vsel %vm116_vm0, %v373_v7, 0  ;;  %396 = vmatprep.subr.bf16.mxu1 %v436_v10  ;;  %v439_v15 = vld [vmem:[#allocation7 + $0x10] sm:$0xff]   ;;  %v441_v17 = vld [vmem:[#allocation7 + $0x18] sm:$0xff]   ;;  %v443_v19 = vld [vmem:[#allocation7 + $0x20] sm:$0xff]   ;;  %p517_p10 = scmp.ne.s32.totalorder %s356_s11, %s516_s12  ;;  %p522_p12 = scmp.lt.s32.totalorder %s516_s12, %s516_s12 }
  0x3d   :  { %126 = vmatpush1.bf16.msra.mxu0 %v430_v5  ;;  %v444_v20 = vld [vmem:[#allocation7 + $0x68] sm:$0xff]   ;;  %v446_v22 = vld [vmem:[#allocation7 + $0x70] sm:$0xff]   ;;  %v448_v24 = vld [vmem:[#allocation7 + $0x78] sm:$0xff]  }
  0x3e   :  { %375 = vmatprep.subr.msk.bf16.mxu0 %vm116_vm0, %v374_v6  ;;  %v445_v21 = vld [vmem:[#allocation7 + $0x28] sm:$0xff]   ;;  %v447_v23 = vld [vmem:[#allocation7 + $0x30] sm:$0xff]   ;;  %v449_v25 = vld [vmem:[#allocation7 + $0x38] sm:$0xff]   ;;  %p523_p13 = por %p522_p12, %p521_p11 }
  0x3f   :  { %397 = vmatpush3.bf16.msra.mxu1 %v437_v11  ;;  %v70_v29 = vld [vmem:[%s645_s2] sm:$0x3] }
  0x40   :  { %398 = vmatprep.subr.bf16.mxu1 %v438_v13  ;;  %v75_v31 = vrot.slane %v70_v29, %v74_v28  ;;  %v79_v32 = vrot.slane %v70_v29, %v78_v30  ;;  %v377_v48 = vld [vmem:[%s647_s4] ss:$0 sm:$0xff]  ;;  %p524_p0 = pnand %p523_p13, %p517_p10 }
  0x41   :  { %128 = vmatpush1.bf16.msra.mxu0 %v118_v12 }
  0x43   :  { %399 = vmatpush3.bf16.msra.mxu1 %v439_v15 }
  0x44   :  { %376 = vmatmul.mubr.msk.bf16.vlgmr.msra.gmra.mrb[0].mxu0 %vm112_vm1, %v433_v14  ;;  %400 = vmatprep.subr.bf16.mxu1 %v440_v16 }
  0x47   :  { %401 = vmatpush3.bf16.msra.mxu1 %v441_v17 }
  0x48   :  { %402 = vmatprep.subr.bf16.mxu1 %v442_v18 }
  0x4b   :  { %403 = vmatpush3.bf16.msra.mxu1 %v443_v19 }
  0x4c   :  { %404 = vmatprep.subr.bf16.mxu1 %v444_v20 }
  0x4f   :  { %405 = vmatpush3.bf16.msra.mxu1 %v445_v21 }
  0x50   :  { %406 = vmatprep.subr.bf16.mxu1 %v446_v22 }
  0x53   :  { %407 = vmatpush3.bf16.msra.mxu1 %v447_v23 }
  0x54   :  { %408 = vmatprep.subr.bf16.mxu1 %v448_v24 }
  0x57   :  { %409 = vmatpush3.bf16.msra.mxu1 %v449_v25 }
 0x117   :  { %v157_v33 = vpop.f32.mrb[0].mxu0 }
 0x118   :  { %v158_v34 = vadd.f32 %v157_v33, %v75_v31  ;;  %v159_v35 = vpop.f32.mrb[1].mxu0 }
 0x119   :  { %v160_v36 = vadd.f32 %v159_v35, %v79_v32  ;;  %v161_v37 = vpop.f32.mrb[2].mxu0 }
 0x11a   :  { %v162_v38 = vadd.f32 %v161_v37, %v75_v31  ;;  %v163_v39 = vpop.f32.mrb[3].mxu0  ;;  %v166_v41 = vmax.f32 %v158_v34, 0.0 }
 0x11b   :  { %v164_v40 = vadd.f32 %v163_v39, %v79_v32  ;;  %v167_v43 = vmax.f32 %v160_v36, 0.0 }
 0x11c   :  { %v168_v42 = vmax.f32 %v162_v38, 0.0 }
 0x11d   :  { %v169_v44 = vmax.f32 %v164_v40, 0.0 }
 0x11e   :  { %v170_v45 = vpack.c.bf16 %v168_v42, %v166_v41 }
 0x11f   :  { %v171_v46 = vpack.c.bf16 %v169_v44, %v167_v43 }
 0x121   :  { %339 = vmatprep.mubr.bf16.mxu1 %v171_v46 }
 0x122   :  { %340 = vmatmul.mubr.bf16.vlgmr.msra.gmra.mrb[0].mxu1 %v170_v45 }
 0x1f5   :  { %v410_v47 = vpop.f32.mrb[0].mxu1 }
 0x1f6   :  { %v411_v49 = vpop.f32.mrb[1].mxu1 }
 0x1f7   :  { %v412_v50 = vadd.f32 %v411_v49, %v410_v47  ;;  %v413_v51 = vpop.f32.mrb[2].mxu1 }
 0x1f8   :  { %v414_v52 = vpop.f32.mrb[3].mxu1 }
 0x1f9   :  { %v342_v53 = vadd.f32 %v412_v50, %v377_v48  ;;  %v415_v54 = vadd.f32 %v414_v52, %v413_v51 }
 0x1fb   :  { %348 = vst [vmem:[#allocation8] sm:$0xff] %v342_v53  ;;  %v345_v55 = vadd.f32 %v415_v54, %v377_v48 }
 0x1fd   :  { %349 = vst [vmem:[#allocation8 + $0x8] sm:$0xff] %v345_v55 }
 0x1fe   :  { %527 = shalt.err (!%p524_p0)
}
 0x1ff   :  { %s528_s14 = scalar_lea.hbm %s648_s5, 256 }
 0x200   :  { %p529_p1 = scmp.ne.s32.totalorder %s648_s5, %s528_s14  ;;  %p532_p2 = scmp.lt.u32.totalorder %s528_s14, %s648_s5 }
 0x202   :  { %p534_p3 = pnand %p532_p2, %p529_p1 }
 0x204   :  { %537 = shalt.err (!%p534_p3)
}
 0x205   :  { %361 = dma.vmem_to_hbm [thread:$0]  %s356_s11, 256, %s648_s5, [#allocation4], %s545_s28, %s545_s28, %s546_s29  }
 0x206   :  { %542 = dma.done.wait [#allocation4], 256  }
 0x207   :  { %543 = vsyncadd [#allocation4], 4294967040 }
 0x208   :  { %365 = vsyncpa [#allocation3], 1 }
 0x209   :  { %366 = vsyncpa [#allocation6], 1 }
 0x20a   :  { %367 = vsyncpa [#allocation4], 1 }

</bundles_post_ra>
